<compile_context>
chip_gen: v7x
topology: tpu7x:2x2x1
jax: 0.10.0
libtpu: 0.0.40
codegen_flags: <defaults>
</compile_context>

<pallas_src>
import functools

import jax
import jax.numpy as jnp
from jax.experimental import pallas as pl
from jax.experimental.pallas import tpu as pltpu

GAMMA = 0.1


def _round_up(n, m):
    return ((n + m - 1) // m) * m


def _vmem_cap_bytes():
    """Per-TensorCore VMEM capacity; conservative 64 MiB (v7x) fallback."""
    try:
        cap = int(pltpu.get_tpu_info().vmem_capacity_bytes)
        if cap > 0:
            return cap
    except Exception:
        pass
    return 64 << 20


def _largest_lane_tile(total, pref):
    """Largest multiple of 128 that divides `total` and is <= pref."""
    pref = max(128, min(pref, total))
    k = pref // 128
    while k > 1 and total % (k * 128) != 0:
        k -= 1
    return k * 128


def _nonlinear_system_kernel(tn, d_pad, sin_t_ref, x_ref, w_ref, b_ref, u_ref,
                             o_ref):
    """grid = (j over output-column panels [outer], i over batch tiles [inner]).

    x_ref: (TM, D_pad) full-K LHS tile   (index_map ignores j)
    w_ref: (D_pad, TN) column panel of W (index_map ignores i -> read once)
    """
    lhs = x_ref[...]
    if lhs.dtype != w_ref.dtype:
        lhs = lhs.astype(w_ref.dtype)          # bf16 matmul path (f32 accum)
    acc = jnp.dot(lhs, w_ref[...], preferred_element_type=jnp.float32)
    h = jnp.tanh(acc + b_ref[...].astype(jnp.float32))

    # Epilogue x columns are a lane-aligned slice of the LHS tile (no extra
    # x input / DMA stream).
    if tn == d_pad:
        x_cols = x_ref[...]
    else:
        col0 = pl.multiple_of(pl.program_id(0) * tn, 128)
        x_cols = x_ref[:, pl.ds(col0, tn)]

    dxdt = (h
            - GAMMA * x_cols.astype(jnp.float32)
            + sin_t_ref[0] * u_ref[...].astype(jnp.float32))
    o_ref[...] = dxdt.astype(o_ref.dtype)


def _prepare_params(w, b, u, matmul_dtype=None):
    """Pad (and optionally cast) parameters once; reuse across f-evaluations."""
    D = w.shape[0]
    assert w.shape == (D, D), "W must be square (state_dim x state_dim)"
    D_pad = _round_up(max(D, 128), 128)
    w_dt = matmul_dtype if matmul_dtype is not None else w.dtype
    w_p = jnp.zeros((D_pad, D_pad), w_dt).at[:D, :D].set(w.astype(w_dt))
    # Keep b / u in f32 so the epilogue is exact even with a bf16 matmul.
    b_p = jnp.zeros((1, D_pad), jnp.float32).at[:, :D].set(
        jnp.asarray(b, jnp.float32).reshape(1, D))
    u_p = jnp.zeros((1, D_pad), jnp.float32).at[:, :D].set(
        jnp.asarray(u, jnp.float32).reshape(1, D))
    return w_p, b_p, u_p, D


def _forward_padded(t, x, w_p, b_p, u_p, *, tm_pref=256):
    B, D = x.shape
    D_pad = w_p.shape[0]
    itemsize_x = jnp.dtype(x.dtype).itemsize
    itemsize_w = jnp.dtype(w_p.dtype).itemsize

    # ---- tile selection ----------------------------------------------------
    TM = _round_up(min(tm_pref, _round_up(B, 8)), 8)
    B_pad = _round_up(B, TM)
    tn = D_pad                                   # prefer full-width panels

    cap = _vmem_cap_bytes()
    budget = cap - (8 << 20)

    def footprint(tm, tnn):
        return (2 * tm * D_pad * itemsize_x      # x tile, double-buffered
                + 2 * D_pad * tnn * itemsize_w   # W panel, double-buffered
                + 2 * tm * tnn * 4               # out tile, double-buffered
                + 4 * tnn * 4 * 2)               # b, u

    while footprint(TM, tn) > budget and tn > 128:
        tn = _largest_lane_tile(D_pad, tn // 2)
    while footprint(TM, tn) > budget and TM > 8:
        TM = _round_up(max(8, TM // 2), 8)
        B_pad = _round_up(B, TM)

    # Guarantee >= 2 parallel programs when cheaply possible (v7x megacore).
    n_i, n_j = B_pad // TM, D_pad // tn
    if n_i * n_j == 1:
        if D_pad % 256 == 0:
            tn = D_pad // 2
        elif B_pad % 16 == 0:
            TM = B_pad // 2
    n_i, n_j = B_pad // TM, D_pad // tn

    # ---- pad the state -----------------------------------------------------
    x_p = x
    if (B_pad, D_pad) != (B, D):
        x_p = jnp.zeros((B_pad, D_pad), x.dtype).at[:B, :D].set(x)

    # sin(t) precomputed outside the kernel; passed as an SMEM scalar.
    sin_t = jnp.sin(jnp.asarray(t, jnp.float32)).reshape(1)

    fp = footprint(TM, tn)
    vmem_limit = int(min(cap - (4 << 20), max(32 << 20, fp + (8 << 20))))

    cost = pl.CostEstimate(
        flops=int(2 * B_pad * D_pad * D_pad),
        transcendentals=int(B_pad * D_pad),
        bytes_accessed=int(n_j * B_pad * D_pad * itemsize_x    # x, re-read per j
                           + D_pad * D_pad * itemsize_w        # W, read once
                           + 2 * D_pad * 4                     # b, u
                           + B_pad * D_pad * 4),               # output
    )

    kernel = functools.partial(_nonlinear_system_kernel, tn, D_pad)

    out_p = pl.pallas_call(
        kernel,
        out_shape=jax.ShapeDtypeStruct((B_pad, D_pad), x.dtype),
        grid=(n_j, n_i),
        in_specs=[
            pl.BlockSpec(memory_space=pltpu.SMEM),             # sin(t)
            pl.BlockSpec((TM, D_pad), lambda j, i: (i, 0)),    # x (full K)
            pl.BlockSpec((D_pad, tn), lambda j, i: (0, j)),    # W panel
            pl.BlockSpec((1, tn), lambda j, i: (0, j)),        # b
            pl.BlockSpec((1, tn), lambda j, i: (0, j)),        # u
        ],
        out_specs=pl.BlockSpec((TM, tn), lambda j, i: (i, j)),
        compiler_params=pltpu.CompilerParams(
            dimension_semantics=("parallel", "parallel"),
            vmem_limit_bytes=vmem_limit,
        ),
        cost_estimate=cost,
    )(sin_t, x_p, w_p, b_p, u_p)

    if (B_pad, D_pad) == (B, D):
        return out_p
    return out_p[:B, :D]


def make_nonlinear_system_f(w, b, u, *, matmul_dtype=None, tm_pref=256,
                            small_shape_fallback=False):
    """Build f(t, x) with parameters padded/cast once (ODE-solver friendly)."""
    w_p, b_p, u_p, D = _prepare_params(w, b, u, matmul_dtype)
    w_f = jnp.asarray(w)
    b_row = jnp.asarray(b, jnp.float32).reshape(1, D)
    u_row = jnp.asarray(u, jnp.float32).reshape(1, D)

    def f(t, x):
        if small_shape_fallback and x.shape[0] < 64 and x.shape[1] < 512:
            # Single-tile pallas_call launch cost dominates at tiny sizes.
            return (jnp.tanh(x @ w_f + b_row) - GAMMA * x
                    + jnp.sin(jnp.asarray(t, jnp.float32)) * u_row
                    ).astype(x.dtype)
        return _forward_padded(t, x, w_p, b_p, u_p, tm_pref=tm_pref)

    return f


def nonlinear_system_forward(t, x, w, b, u, **kwargs):
    """One-shot convenience wrapper (pads parameters on every call)."""
    return make_nonlinear_system_f(w, b, u, **kwargs)(t, x)


def nonlinear_system_ref(t, x, w, b, u):
    """Pure-JAX reference for correctness checking."""
    h = jnp.tanh(jnp.dot(x, w, preferred_element_type=jnp.float32)
                 + b.reshape(1, -1))
    return (h - GAMMA * x
            + jnp.sin(jnp.asarray(t, jnp.float32)) * u.reshape(1, -1))


if __name__ == "__main__":
    key = jax.random.PRNGKey(0)

    # --- small shapes consistent with the module's (batch_size, state_dim) ---
    kx, kw, kb, ku = jax.random.split(key, 4)
    B, D = 8, 32
    x = jax.random.normal(kx, (B, D), jnp.float32)
    w = 0.3 * jax.random.normal(kw, (D, D), jnp.float32)
    b = 0.1 * jax.random.normal(kb, (1, D), jnp.float32)
    u = jax.random.normal(ku, (1, D), jnp.float32)
    t = 0.5

    f_small = make_nonlinear_system_f(w, b, u)            # Pallas path
    out = jax.block_until_ready(f_small(t, x))
    ref = nonlinear_system_ref(t, x, w, b, u)
    assert out.shape == (B, D) and out.dtype == jnp.float32
    assert jnp.allclose(out, ref, atol=1e-2, rtol=1e-2), "small-shape mismatch"

    # --- larger shapes exercising the multi-tile (j, i) grid + lane slicing ---
    k2x, k2w, k2b, k2u = jax.random.split(jax.random.PRNGKey(1), 4)
    B2, D2 = 128, 1024
    x2 = jax.random.normal(k2x, (B2, D2), jnp.float32)
    w2 = 0.03 * jax.random.normal(k2w, (D2, D2), jnp.float32)
    b2 = 0.1 * jax.random.normal(k2b, (1, D2), jnp.float32)
    u2 = jax.random.normal(k2u, (1, D2), jnp.float32)
    t2 = 1.25

    f_large = make_nonlinear_system_f(w2, b2, u2)
    out2 = jax.block_until_ready(f_large(t2, x2))
    ref2 = nonlinear_system_ref(t2, x2, w2, b2, u2)
    assert out2.shape == (B2, D2)
    assert jnp.allclose(out2, ref2, atol=1e-2, rtol=1e-2), "large-shape mismatch"

    # --- bf16-W matmul path (f32 accumulation / epilogue), looser tolerance ---
    f_bf16 = make_nonlinear_system_f(w2, b2, u2, matmul_dtype=jnp.bfloat16)
    out3 = jax.block_until_ready(f_bf16(t2, x2))
    assert out3.shape == (B2, D2)
    assert jnp.allclose(out3, ref2, atol=5e-2, rtol=5e-2), "bf16-path mismatch"

    print("KERNEL_OK")
</pallas_src>

<mosaic_0001>
module attributes {stable_mosaic.version = 11 : i64} {
  func.func @_nonlinear_system_kernel(%arg0: i32, %arg1: i32, %arg2: memref<1xf32, #tpu.memory_space<smem>>, %arg3: memref<8x128xf32, #tpu.memory_space<vmem>>, %arg4: memref<128x128xf32, #tpu.memory_space<vmem>>, %arg5: memref<1x128xf32, #tpu.memory_space<vmem>>, %arg6: memref<1x128xf32, #tpu.memory_space<vmem>>, %arg7: memref<8x128xf32, #tpu.memory_space<vmem>>) attributes {dimension_semantics = [#tpu.dimension_semantics<parallel>, #tpu.dimension_semantics<parallel>], iteration_bounds = array<i64: 1, 1>, scalar_prefetch = 0 : i64, scratch_operands = 0 : i64, tpu.core_type = #tpu.core_type<tc>, window_params = [{transform_indices = @transform_0, window_bounds = array<i64: 1>}, {transform_indices = @transform_1, window_bounds = array<i64: 8, 128>}, {transform_indices = @transform_2, window_bounds = array<i64: 128, 128>}, {transform_indices = @transform_3, window_bounds = array<i64: 1, 128>}, {transform_indices = @transform_4, window_bounds = array<i64: 1, 128>}, {transform_indices = @transform_5, window_bounds = array<i64: 8, 128>}]} {
    %c0 = arith.constant 0 : index
    %c0_0 = arith.constant 0 : index
    %0 = vector.load %arg3[%c0, %c0_0] : memref<8x128xf32, #tpu.memory_space<vmem>>, vector<8x128xf32>
    %c0_1 = arith.constant 0 : index
    %c0_2 = arith.constant 0 : index
    %1 = vector.load %arg4[%c0_1, %c0_2] : memref<128x128xf32, #tpu.memory_space<vmem>>, vector<128x128xf32>
    %cst = arith.constant dense<0.000000e+00> : vector<8x128xf32>
    %2 = tpu.matmul %0, %1, %cst {dimension_numbers = #tpu.dot_dimension_numbers<[1], [0], [0], [1], [0, 0, 1, 1], [], []>} : vector<8x128xf32>, vector<128x128xf32>, vector<8x128xf32> -> vector<8x128xf32>
    %c0_3 = arith.constant 0 : index
    %c0_4 = arith.constant 0 : index
    %3 = vector.load %arg5[%c0_3, %c0_4] : memref<1x128xf32, #tpu.memory_space<vmem>>, vector<1x128xf32>
    %4 = vector.broadcast %3 : vector<1x128xf32> to vector<8x128xf32>
    %5 = arith.addf %2, %4 : vector<8x128xf32>
    %6 = math.tanh %5 : vector<8x128xf32>
    %c0_5 = arith.constant 0 : index
    %c0_6 = arith.constant 0 : index
    %7 = vector.load %arg3[%c0_5, %c0_6] : memref<8x128xf32, #tpu.memory_space<vmem>>, vector<8x128xf32>
    %cst_7 = arith.constant 1.000000e-01 : f32
    %8 = vector.broadcast %cst_7 : f32 to vector<8x128xf32>
    %9 = arith.mulf %8, %7 : vector<8x128xf32>
    %10 = arith.subf %6, %9 : vector<8x128xf32>
    %c0_8 = arith.constant 0 : index
    %11 = memref.load %arg2[%c0_8] : memref<1xf32, #tpu.memory_space<smem>>
    %c0_9 = arith.constant 0 : index
    %c0_10 = arith.constant 0 : index
    %12 = vector.load %arg6[%c0_9, %c0_10] : memref<1x128xf32, #tpu.memory_space<vmem>>, vector<1x128xf32>
    %13 = vector.broadcast %11 : f32 to vector<1x128xf32>
    %14 = arith.mulf %13, %12 : vector<1x128xf32>
    %15 = vector.broadcast %14 : vector<1x128xf32> to vector<8x128xf32>
    %16 = arith.addf %10, %15 : vector<8x128xf32>
    %c0_11 = arith.constant 0 : index
    %c0_12 = arith.constant 0 : index
    %17 = vector.load %arg7[%c0_11, %c0_12] : memref<8x128xf32, #tpu.memory_space<vmem>>, vector<8x128xf32>
    tpu.vector_store %arg7[%c0_11, %c0_12], %16 {strides = array<i32>} : memref<8x128xf32, #tpu.memory_space<vmem>>, vector<8x128xf32>,
    return
  }
  func.func @transform_0(%arg0: i32, %arg1: i32) -> i32 {
    %c0_i32 = arith.constant 0 : i32
    %c0_i32_0 = arith.constant 0 : i32
    return %c0_i32 : i32
  }
  func.func @transform_1(%arg0: i32, %arg1: i32) -> (i32, i32) {
    %c0_i32 = arith.constant 0 : i32
    %c0_i32_0 = arith.constant 0 : i32
    return %arg1, %c0_i32 : i32, i32
  }
  func.func @transform_2(%arg0: i32, %arg1: i32) -> (i32, i32) {
    %c0_i32 = arith.constant 0 : i32
    %c0_i32_0 = arith.constant 0 : i32
    return %c0_i32, %arg0 : i32, i32
  }
  func.func @transform_3(%arg0: i32, %arg1: i32) -> (i32, i32) {
    %c0_i32 = arith.constant 0 : i32
    %c0_i32_0 = arith.constant 0 : i32
    return %c0_i32, %arg0 : i32, i32
  }
  func.func @transform_4(%arg0: i32, %arg1: i32) -> (i32, i32) {
    %c0_i32 = arith.constant 0 : i32
    %c0_i32_0 = arith.constant 0 : i32
    return %c0_i32, %arg0 : i32, i32
  }
  func.func @transform_5(%arg0: i32, %arg1: i32) -> (i32, i32) {
    %c0_i32 = arith.constant 0 : i32
    return %arg1, %arg0 : i32, i32
  }
}

</mosaic_0001>

<bundles_post_ra>
// kernel: tpu_custom_call.1
= control target key start
LH: loop header
LB: loop body
LE: loop exit
PB: predicated region body
PF: predicated region fallthrough
CT: control target
= control target key end

     0   :  { %11 = vsyncpa [#allocation4], 0  ;;  %s422_s0 = inlined_call_operand.<no memory space> [shape: f32[1], index: 0, kind: input, shape index: {}]   ;;  %s423_s1 = inlined_call_operand.hbm [shape: f32[8,128], index: 1, kind: input, shape index: {}]   ;;  %s424_s2 = inlined_call_operand.hbm [shape: f32[128,128], index: 2, kind: input, shape index: {}]   ;;  %s425_s3 = inlined_call_operand.vmem [shape: f32[1,128], index: 3, kind: input, shape index: {}]   ;;  %s426_s4 = inlined_call_operand.vmem [shape: f32[1,128], index: 4, kind: input, shape index: {}]   ;;  %s427_s5 = inlined_call_operand.hbm [shape: f32[8,128], index: 5, kind: output, shape index: {}]  }
   0x1   :  { %12 = vsyncpa [#allocation7], 0 }
   0x2   :  { %13 = vsyncpa [#allocation5], 0  ;;  %s332_s18 = smov [#allocation3]   ;;  %s333_s20 = smov [#allocation6]  }
   0x3   :  { %s22_s19 = sshll.u32 %s332_s18, 4  ;;  %s31_s21 = sshll.u32 %s333_s20, 4  ;;  %s23_s19 = int_to_ptr.vmem [resolvable:$true] %s22_s19  ;;  %s370_s21 = int_to_ptr.vmem [resolvable:$true] %s31_s21 }
   0x4   :  { %s260_s24 = scalar_lea.hbm %s423_s1, 128 }
   0x5   :  { %p261_p0 = scmp.ne.s32.totalorder %s423_s1, %s260_s24  ;;  %p264_p1 = scmp.lt.u32.totalorder %s260_s24, %s423_s1 }
   0x7   :  { %p266_p2 = pnand %p264_p1, %p261_p0 }
   0x9   :  { %269 = shalt.err (!%p266_p2)
}
   0xa   :  { %s270_s29 = scalar_lea.vmem %s23_s19, 128  ;;  %p275_p4 = scmp.lt.s32.totalorder %s23_s19, %s23_s19 }
   0xb   :  { %p271_p3 = scmp.ne.s32.totalorder %s23_s19, %s270_s29  ;;  %p276_p5 = scmp.lt.s32.totalorder %s270_s29, %s270_s29 }
   0xd   :  { %p277_p6 = por %p276_p5, %p275_p4 }
   0xf   :  { %p278_p7 = pnand %p277_p6, %p271_p3 }
  0x11   :  { %281 = shalt.err (!%p278_p7)
}
  0x12   :  { %25 = dma.hbm_to_vmem [thread:$0]  %s423_s1, 128, %s23_s19, [#allocation4]  }
  0x13   :  { %s282_s9 = scalar_lea.hbm %s424_s2, 2048 }
  0x14   :  { %p283_p8 = scmp.ne.s32.totalorder %s424_s2, %s282_s9  ;;  %p286_p9 = scmp.lt.u32.totalorder %s282_s9, %s424_s2 }
  0x16   :  { %p288_p10 = pnand %p286_p9, %p283_p8 }
  0x18   :  { %291 = shalt.err (!%p288_p10)
}
  0x19   :  { %s292_s14 = scalar_lea.vmem %s370_s21, 2048  ;;  %p297_p12 = scmp.lt.s32.totalorder %s370_s21, %s370_s21 }
  0x1a   :  { %p293_p11 = scmp.ne.s32.totalorder %s370_s21, %s292_s14  ;;  %p298_p13 = scmp.lt.s32.totalorder %s292_s14, %s292_s14 }
  0x1c   :  { %p299_p0 = por %p298_p13, %p297_p12 }
  0x1e   :  { %p300_p1 = pnand %p299_p0, %p293_p11 }
  0x20   :  { %303 = shalt.err (!%p300_p1)
}
  0x21   :  { %s334_s1 = smov 128   ;;  %s335_s15 = smov 8  }
  0x22   :  { %37 = dma.hbm_to_vmem [thread:$0]  %s424_s2, 2048, %s370_s21, [#allocation7], %s334_s1, %s334_s1, %s335_s15  }
  0x23   :  { %326 = dma.done.wait [#allocation4], 128  }
  0x24   :  { %327 = vsyncadd [#allocation4], 4294967168 }
  0x25   :  { %328 = dma.done.wait [#allocation7], 2048  }
  0x26   :  { %329 = vsyncadd [#allocation7], 4294965248  ;;  %v336_v0 = vmov 0.0|0.0   ;;  %vm337_vm0 = vmmov 0   ;;  %v338_v1 = vmov 0.0   ;;  %v49_v2 = vld [vmem:[#allocation6] sm:$0xff]  ;;  %v150_v29 = vlaneseq }
  0x27   :  { %226 = vmatprep.subr.bf16.mxu0 %v336_v0  ;;  %223 = vmatprep.mubr.msk.f32.mxu0 %vm337_vm0, %v338_v1  ;;  %v50_v3 = vld [vmem:[#allocation6 + $0x8] sm:$0xff]  ;;  %v51_v4 = vld [vmem:[#allocation6 + $0x10] sm:$0xff]  ;;  %v52_v6 = vld [vmem:[#allocation6 + $0x18] sm:$0xff]  ;;  %v147_v34 = vstv %s422_s0 }
  0x28   :  { %v227_v5 = vpack.c.bf16 %v50_v3, %v49_v2  ;;  %v230_v7 = vpack.c.bf16 %v52_v6, %v51_v4  ;;  %v53_v8 = vld [vmem:[#allocation6 + $0x20] sm:$0xff]  ;;  %v54_v9 = vld [vmem:[#allocation6 + $0x28] sm:$0xff]  ;;  %v55_v11 = vld [vmem:[#allocation6 + $0x30] sm:$0xff]  ;;  %v151_v32 = vshrl.u32 %v150_v29, 7 }
  0x29   :  { %v233_v10 = vpack.c.bf16 %v54_v9, %v53_v8  ;;  %v56_v12 = vld [vmem:[#allocation6 + $0x38] sm:$0xff]  ;;  %v57_v14 = vld [vmem:[#allocation6 + $0x40] sm:$0xff]  ;;  %v58_v15 = vld [vmem:[#allocation6 + $0x48] sm:$0xff] }
  0x2a   :  { %228 = vmatpush3.bf16.msra.mxu0 %v227_v5  ;;  %v236_v13 = vpack.c.bf16 %v56_v12, %v55_v11  ;;  %v239_v16 = vpack.c.bf16 %v58_v15, %v57_v14  ;;  %v59_v17 = vld [vmem:[#allocation6 + $0x50] sm:$0xff]  ;;  %v60_v18 = vld [vmem:[#allocation6 + $0x58] sm:$0xff]  ;;  %v61_v20 = vld [vmem:[#allocation6 + $0x60] sm:$0xff]  ;;  %v152_v36 = vsub.s32 0, %v151_v32 }
  0x2b   :  { %229 = vmatprep.subr.bf16.mxu0 %v336_v0  ;;  %v242_v19 = vpack.c.bf16 %v60_v18, %v59_v17  ;;  %v62_v21 = vld [vmem:[#allocation6 + $0x68] sm:$0xff]  ;;  %v63_v23 = vld [vmem:[#allocation6 + $0x70] sm:$0xff]  ;;  %v64_v24 = vld [vmem:[#allocation6 + $0x78] sm:$0xff] }
  0x2c   :  { %v245_v22 = vpack.c.bf16 %v62_v21, %v61_v20  ;;  %v248_v25 = vpack.c.bf16 %v64_v24, %v63_v23  ;;  %v48_v26 = vld [vmem:[#allocation3] sm:$0xff] }
  0x2d   :  { %v173_v27 = vld [vmem:[%s425_s3] ss:$0 sm:$0xff]  ;;  %v143_v37 = vmul.f32 0.1, %v48_v26  ;;  %s339_s3 = smov [#allocation8]  }
  0x2e   :  { %231 = vmatpush3.bf16.msra.mxu0 %v230_v7  ;;  %v146_v33 = vld [vmem:[%s426_s4] sm:$0x1]  ;;  %s163_s23 = sshll.u32 %s339_s3, 4  ;;  %s164_s23 = int_to_ptr.vmem [resolvable:$true] %s163_s23 }
  0x2f   :  { %232 = vmatprep.subr.bf16.mxu0 %v336_v0  ;;  %v148_v35 = vmul.f32 %v147_v34, %v146_v33  ;;  %s304_s24 = scalar_lea.vmem %s164_s23, 128  ;;  %p309_p3 = scmp.lt.s32.totalorder %s164_s23, %s164_s23 }
  0x30   :  { %p305_p2 = scmp.ne.s32.totalorder %s164_s23, %s304_s24  ;;  %p310_p4 = scmp.lt.s32.totalorder %s304_s24, %s304_s24 }
  0x31   :  { %v153_v38 = vrot.slane %v148_v35, %v152_v36 }
  0x32   :  { %234 = vmatpush3.bf16.msra.mxu0 %v233_v10  ;;  %p311_p5 = por %p310_p4, %p309_p3 }
  0x33   :  { %235 = vmatprep.subr.bf16.mxu0 %v336_v0 }
  0x34   :  { %p312_p6 = pnand %p311_p5, %p305_p2 }
  0x36   :  { %237 = vmatpush3.bf16.msra.mxu0 %v236_v13 }
  0x37   :  { %238 = vmatprep.subr.bf16.mxu0 %v336_v0 }
  0x3a   :  { %240 = vmatpush3.bf16.msra.mxu0 %v239_v16 }
  0x3b   :  { %241 = vmatprep.subr.bf16.mxu0 %v336_v0 }
  0x3e   :  { %243 = vmatpush3.bf16.msra.mxu0 %v242_v19 }
  0x3f   :  { %244 = vmatprep.subr.bf16.mxu0 %v336_v0 }
  0x42   :  { %246 = vmatpush3.bf16.msra.mxu0 %v245_v22 }
  0x43   :  { %247 = vmatprep.subr.bf16.mxu0 %v336_v0 }
  0x46   :  { %249 = vmatpush3.bf16.msra.mxu0 %v248_v25 }
  0x49   :  { %224 = vmatmul.mubr.f32.vlgmr.msra.gmra.mrb[0].mxu0 %v48_v26 }
 0x11c   :  { %v138_v28 = vpop.f32.mrb[0].mxu0 }
 0x11d   :  { %v139_v30 = vadd.f32 %v173_v27, %v138_v28  ;;  %v225_v31 = vpop.f32.mrb[1].mxu0 }
 0x11f   :  { %258 = vtanh.f32 %v139_v30 }
 0x129   :  { %v259_v39 = vpop.eup %258 }
 0x12a   :  { %v144_v40 = vsub.f32 %v259_v39, %v143_v37 }
 0x12c   :  { %v155_v41 = vadd.f32 %v153_v38, %v144_v40 }
 0x12e   :  { %156 = vst [vmem:[#allocation8] sm:$0xff] %v155_v41 }
 0x12f   :  { %315 = shalt.err (!%p312_p6)
}
 0x130   :  { %s316_s25 = scalar_lea.hbm %s427_s5, 128 }
 0x131   :  { %p317_p7 = scmp.ne.s32.totalorder %s427_s5, %s316_s25  ;;  %p320_p8 = scmp.lt.u32.totalorder %s316_s25, %s427_s5 }
 0x133   :  { %p322_p9 = pnand %p320_p8, %p317_p7 }
 0x135   :  { %325 = shalt.err (!%p322_p9)
}
 0x136   :  { %166 = dma.vmem_to_hbm [thread:$0]  %s164_s23, 128, %s427_s5, [#allocation5]  }
 0x137   :  { %330 = dma.done.wait [#allocation5], 128  }
 0x138   :  { %331 = vsyncadd [#allocation5], 4294967168 }
 0x139   :  { %170 = vsyncpa [#allocation4], 1 }
 0x13a   :  { %171 = vsyncpa [#allocation7], 1 }
 0x13b   :  { %172 = vsyncpa [#allocation5], 1 }

</bundles_post_ra>
